<compile_context>
chip_gen: v5e
topology: v5e:2x2
jax: 0.10.0
libtpu: 0.0.40
codegen_flags: <defaults>
</compile_context>

<pallas_src>
import functools

import jax
import jax.numpy as jnp
from jax import lax
from jax.experimental import pallas as pl
from jax.experimental.pallas import tpu as pltpu


def _round_up(x, m):
    return ((x + m - 1) // m) * m


def _choose_tb(batch, block_b):
    """Largest batch tile (<= block_b) with <=12.5% padding waste and >=2 grid steps."""
    cands = [t for t in (512, 256, 128, 64, 32, 16, 8) if t <= block_b] or [8]
    for tb in cands:
        bp = _round_up(batch, tb)
        if bp // tb >= 2 and (bp - batch) * 8 <= bp:
            return tb
    return cands[-1]


def _vmem_capacity_bytes():
    """Generation-aware VMEM capacity (v5e/v6e: 128 MiB, v7x: 64 MiB per core)."""
    try:
        cap = int(pltpu.get_tpu_info().vmem_capacity_bytes)
        if cap > 0:
            return cap
    except Exception:
        pass
    return 64 << 20  # conservative fallback (v7x per-core VMEM)


def lightse_kernel(x_ref, w_ref, o_ref, *, valid_d):
    # x_ref: (TB, D) activation tile.
    # w_ref: (D, Dp) pre-transposed (in, out) weight, resident in VMEM for the
    #        whole grid (single copy, not pipelined).
    # o_ref: (TB, Dp) softmax output tile (lane-dense).
    x = x_ref[...].astype(w_ref.dtype)  # bf16 cast feeds the MXU fast path
    logits = jnp.dot(x, w_ref[...], preferred_element_type=jnp.float32)  # (TB, Dp) f32

    if valid_d < logits.shape[-1]:
        # Zero-padded output columns must not participate in the softmax.
        col = lax.broadcasted_iota(jnp.int32, logits.shape, 1)
        logits = jnp.where(col < valid_d, logits, jnp.float32(-1e30))

    m = jnp.max(logits, axis=-1, keepdims=True)
    e = jnp.exp(logits - m)
    denom = jnp.sum(e, axis=-1, keepdims=True)
    # Exact reciprocal: rows must sum to 1 (approx=True has ~4e-3 rel. error).
    o_ref[...] = (e * (1.0 / denom)).astype(o_ref.dtype)


def lightse_forward(x, weight, *, block_b=512, matmul_dtype=jnp.bfloat16):
    """LightSE forward: softmax(x @ weight^T, axis=-1).

    x:      (B, D)
    weight: (D, D) in PyTorch nn.Linear layout (out_features, in_features).
    """
    B, D = x.shape
    assert weight.shape == (D, D)

    Dp = max(128, _round_up(D, 128))  # lane-dense output feature axis
    TB = _choose_tb(B, block_b)
    Bp = _round_up(B, TB)

    # One-time weight prep (in a real model: do once at parameter-init time).
    # Transpose to (in, out) so the kernel is a plain MXU matmul (no in-kernel
    # transpose), cast to the matmul dtype, pad out-features to lane width.
    w_t = weight.T.astype(matmul_dtype)
    if Dp != D:
        w_t = jnp.pad(w_t, ((0, 0), (0, Dp - D)))

    # x only needs a copy when the batch must be rounded up to the tile.
    x_p = jnp.pad(x, ((0, Bp - B), (0, 0))) if Bp != B else x

    # VMEM budget: resident weight (single copy) + double-buffered x/out tiles
    # + f32 elementwise intermediates + slack; capped at 7/8 of chip VMEM.
    w_itemsize = jnp.dtype(matmul_dtype).itemsize
    x_itemsize = x.dtype.itemsize
    need = (
        D * Dp * w_itemsize
        + 2 * TB * D * x_itemsize
        + 2 * TB * Dp * x_itemsize
        + 4 * TB * Dp * 4
        + (2 << 20)
    )
    cap = _vmem_capacity_bytes()
    vmem_limit = int(min(cap - cap // 8, max(need, 32 << 20)))

    cost = pl.CostEstimate(
        flops=2 * Bp * D * Dp,
        transcendentals=Bp * Dp,
        bytes_accessed=(
            Bp * D * x_itemsize + D * Dp * w_itemsize + Bp * Dp * x_itemsize
        ),
    )

    out = pl.pallas_call(
        functools.partial(lightse_kernel, valid_d=D),
        out_shape=jax.ShapeDtypeStruct((Bp, Dp), x.dtype),
        grid=(Bp // TB,),
        in_specs=[
            pl.BlockSpec((TB, D), lambda i: (i, 0)),            # x: streamed over batch
            pl.BlockSpec(memory_space=pltpu.MemorySpace.VMEM),  # W: resident, single copy
        ],
        out_specs=pl.BlockSpec((TB, Dp), lambda i: (i, 0)),
        compiler_params=pltpu.CompilerParams(
            dimension_semantics=("parallel",),
            vmem_limit_bytes=vmem_limit,
        ),
        cost_estimate=cost,
    )(x_p, w_t)

    if (Bp, Dp) != (B, D):
        out = out[:B, :D]
    return out


def lightse_reference(x, weight):
    logits = x.astype(jnp.float32) @ weight.T.astype(jnp.float32)
    return jax.nn.softmax(logits, axis=-1).astype(x.dtype)


if __name__ == "__main__":
    key = jax.random.PRNGKey(0)
    k_x, k_w, k_x2, k_w2 = jax.random.split(key, 4)

    # Case 1: the module's toy shape (batch=8, input_dim=32).
    B, input_dim = 8, 32
    x = jax.random.normal(k_x, (B, input_dim), dtype=jnp.float32)
    bound = 1.0 / jnp.sqrt(jnp.float32(input_dim))
    weight = jax.random.uniform(
        k_w, (input_dim, input_dim), dtype=jnp.float32, minval=-bound, maxval=bound
    )

    y = jax.block_until_ready(lightse_forward(x, weight))
    y_ref = lightse_reference(x, weight)
    assert y.shape == (B, input_dim)
    assert jnp.allclose(y, y_ref, atol=2e-3, rtol=2e-3), "mismatch vs reference (case 1)"
    assert jnp.allclose(jnp.sum(y, axis=-1), 1.0, atol=1e-3)

    # Case 2: exercises a multi-step batch grid and lane padding (D % 128 != 0).
    B2, D2 = 40, 48
    x2 = jax.random.normal(k_x2, (B2, D2), dtype=jnp.float32)
    bound2 = 1.0 / jnp.sqrt(jnp.float32(D2))
    w2 = jax.random.uniform(
        k_w2, (D2, D2), dtype=jnp.float32, minval=-bound2, maxval=bound2
    )
    y2 = jax.block_until_ready(lightse_forward(x2, w2, block_b=16))
    y2_ref = lightse_reference(x2, w2)
    assert y2.shape == (B2, D2)
    assert jnp.allclose(y2, y2_ref, atol=2e-3, rtol=2e-3), "mismatch vs reference (case 2)"
    assert jnp.allclose(jnp.sum(y2, axis=-1), 1.0, atol=1e-3)

    print("KERNEL_OK")
</pallas_src>

<mosaic_0001>
module attributes {stable_mosaic.version = 11 : i64} {
  func.func @lightse_kernel(%arg0: i32, %arg1: memref<8x32xf32, #tpu.memory_space<vmem>>, %arg2: memref<32x128xbf16, #tpu.memory_space<vmem>>, %arg3: memref<8x128xf32, #tpu.memory_space<vmem>>) attributes {dimension_semantics = [#tpu.dimension_semantics<parallel>], iteration_bounds = array<i64: 1>, scalar_prefetch = 0 : i64, scratch_operands = 0 : i64, tpu.core_type = #tpu.core_type<tc>, window_params = [{transform_indices = @transform_0, window_bounds = array<i64: 8, 32>}, {pipeline_mode = #tpu.pipeline_mode<synchronous>, transform_indices = @transform_1, window_bounds = array<i64: 32, 128>}, {transform_indices = @transform_2, window_bounds = array<i64: 8, 128>}]} {
    %c0 = arith.constant 0 : index
    %c0_0 = arith.constant 0 : index
    %0 = vector.load %arg1[%c0, %c0_0] : memref<8x32xf32, #tpu.memory_space<vmem>>, vector<8x32xf32>
    %1 = arith.truncf %0 : vector<8x32xf32> to vector<8x32xbf16>
    %c0_1 = arith.constant 0 : index
    %c0_2 = arith.constant 0 : index
    %2 = vector.load %arg2[%c0_1, %c0_2] : memref<32x128xbf16, #tpu.memory_space<vmem>>, vector<32x128xbf16>
    %cst = arith.constant dense<0.000000e+00> : vector<8x128xf32>
    %3 = tpu.matmul %1, %2, %cst {dimension_numbers = #tpu.dot_dimension_numbers<[1], [0], [0], [1], [0, 0, 1, 1], [], []>} : vector<8x32xbf16>, vector<32x128xbf16>, vector<8x128xf32> -> vector<8x128xf32>
    %4 = tpu.iota {dimensions = array<i32: 1>} : vector<8x128xi32>
    %c32_i32 = arith.constant 32 : i32
    %5 = vector.broadcast %c32_i32 : i32 to vector<8x128xi32>
    %6 = arith.cmpi slt, %4, %5 : vector<8x128xi32>
    %cst_3 = arith.constant -1.000000e+30 : f32
    %7 = vector.broadcast %cst_3 : f32 to vector<8x128xf32>
    %8 = arith.select %6, %3, %7 : vector<8x128xi1>, vector<8x128xf32>
    %cst_4 = arith.constant dense<0xFF800000> : vector<8xf32>
    %9 = vector.multi_reduction <maximumf>, %8, %cst_4 [1] : vector<8x128xf32> to vector<8xf32>
    %10 = vector.shape_cast %9 : vector<8xf32> to vector<8x1xf32>
    %11 = vector.broadcast %10 : vector<8x1xf32> to vector<8x128xf32>
    %12 = arith.subf %8, %11 : vector<8x128xf32>
    %13 = math.exp %12 : vector<8x128xf32>
    %cst_5 = arith.constant dense<0.000000e+00> : vector<8xf32>
    %14 = vector.multi_reduction <add>, %13, %cst_5 [1] : vector<8x128xf32> to vector<8xf32>
    %15 = vector.shape_cast %14 : vector<8xf32> to vector<8x1xf32>
    %cst_6 = arith.constant 1.000000e+00 : f32
    %16 = vector.broadcast %cst_6 : f32 to vector<8x1xf32>
    %17 = arith.divf %16, %15 : vector<8x1xf32>
    %18 = vector.broadcast %17 : vector<8x1xf32> to vector<8x128xf32>
    %19 = arith.mulf %13, %18 : vector<8x128xf32>
    %c0_7 = arith.constant 0 : index
    %c0_8 = arith.constant 0 : index
    %20 = vector.load %arg3[%c0_7, %c0_8] : memref<8x128xf32, #tpu.memory_space<vmem>>, vector<8x128xf32>
    tpu.vector_store %arg3[%c0_7, %c0_8], %19 {strides = array<i32>} : memref<8x128xf32, #tpu.memory_space<vmem>>, vector<8x128xf32>,
    return
  }
  func.func @transform_0(%arg0: i32) -> (i32, i32) {
    %c0_i32 = arith.constant 0 : i32
    %c0_i32_0 = arith.constant 0 : i32
    return %arg0, %c0_i32 : i32, i32
  }
  func.func @transform_1(%arg0: i32) -> (i32, i32) {
    %c0_i32 = arith.constant 0 : i32
    %c0_i32_0 = arith.constant 0 : i32
    %c0_i32_1 = arith.constant 0 : i32
    return %c0_i32, %c0_i32_0 : i32, i32
  }
  func.func @transform_2(%arg0: i32) -> (i32, i32) {
    %c0_i32 = arith.constant 0 : i32
    %c0_i32_0 = arith.constant 0 : i32
    return %arg0, %c0_i32 : i32, i32
  }
}

</mosaic_0001>

<bundles_post_ra>
// kernel: tpu_custom_call.1
= control target key start
LH: loop header
LB: loop body
LE: loop exit
PB: predicated region body
PF: predicated region fallthrough
CT: control target
= control target key end

     0   :  { %7 = vsyncpa [#allocation3], 0  ;;  %s251_s0 = inlined_call_operand.hbm [shape: f32[8,32], index: 0, kind: input, shape index: {}]   ;;  %s252_s1 = inlined_call_operand.hbm [shape: bf16[32,128], index: 1, kind: input, shape index: {}]   ;;  %s253_s2 = inlined_call_operand.hbm [shape: f32[8,128], index: 2, kind: output, shape index: {}]  }
   0x1   :  { %8 = vsyncpa [#allocation6], 0 }
   0x2   :  { %9 = vsyncpa [#allocation4], 0  ;;  %s15_s11 = sshll.u32 %s251_s0, 4  ;;  %s222_s12 = smov [#allocation2]   ;;  %s16_s11 = int_to_ptr.hbm [resolvable:$true] %s15_s11 }
   0x3   :  { %s17_s13 = sshll.u32 %s222_s12, 4  ;;  %s25_s16 = sshll.u32 %s252_s1, 4  ;;  %s18_s13 = int_to_ptr.vmem [resolvable:$true] %s17_s13  ;;  %s26_s16 = int_to_ptr.hbm [resolvable:$true] %s25_s16 }
   0x4   :  { %20 = dma.hbm_to_vmem [thread:$0]  %s16_s11, 128, %s18_s13, [#allocation3]  }
   0x5   :  { %s223_s17 = smov [#allocation5]   ;;  %s224_s19 = smov 64  }
   0x6   :  { %s27_s18 = sshll.u32 %s223_s17, 4  ;;  %s225_s20 = smov 4   ;;  %s28_s18 = int_to_ptr.vmem [resolvable:$true] %s27_s18 }
   0x7   :  { %33 = dma.hbm_to_vmem [thread:$0]  %s26_s16, 256, %s28_s18, [#allocation6], %s224_s19, %s224_s19, %s225_s20  }
   0x8   :  { %216 = dma.done.wait [#allocation3], 128  }
   0x9   :  { %217 = vsyncadd [#allocation3], 4294967168 }
   0xa   :  { %218 = dma.done.wait [#allocation6], 256  }
   0xb   :  { %219 = vsyncadd [#allocation6], 4294967040  ;;  %v134_v0 = vld [vmem:[#allocation5 + $0x8] sm:$0xff]  ;;  %v133_v1 = vld [vmem:[#allocation5] sm:$0xff]  ;;  %vm61_vm0 = vcmask 261120   ;;  %v78_v4 = vlaneseq  ;;  %s226_s0 = smov [#allocation7]  }
   0xc   :  { %71 = vmatpush.bf16.msra.mxu0 %v134_v0  ;;  %v43_v2 = vld [vmem:[#allocation2] sm:$0xff]  ;;  %s111_s1 = sshll.u32 %s226_s0, 4  ;;  %s113_s23 = sshll.u32 %s253_s2, 4  ;;  %s112_s1 = int_to_ptr.vmem [resolvable:$true] %s111_s1  ;;  %s114_s23 = int_to_ptr.hbm [resolvable:$true] %s113_s23 }
   0xd   :  { %v44_v3 = vpack.c.bf16 %v43_v2, %v43_v2  ;;  %v79_v5 = vand.u32 127, %v78_v4 }
   0xf   :  { %vm80_vm1 = vcmp.lt.s32.totalorder %v79_v5, 32 }
  0x10   :  { %72 = vmatpush.bf16.msra.mxu0 %v133_v1 }
  0x13   :  { %132 = vmatmul.msk.bf16.vlgmr.msra.gmra.mxu0 %vm61_vm0, %v44_v3 }
  0x90   :  { %v74_v6 = vpop.f32.mrf.mxu0 }
  0x91   :  { %v81_v7 = vsel %vm80_vm1, %v74_v6, -1e+30 }
  0x92   :  { %82 = vmax.xlane.f32.xlu0 %v81_v7 }
  0x98   :  { %v76_v8 = vpop.f32.mrf.mxu0 }
 0x105   :  { %v83_v9 = vpop.xlane.xlu0 %82 }
 0x106   :  { %v84_v10 = vsub.f32 %v81_v7, %v83_v9 }
 0x108   :  { %v85_v11 = vmul.f32 1.442695, %v84_v10 }
 0x10a   :  { %140 = vpow2.f32 %v85_v11 }
 0x110   :  { %v141_v12 = vpop.eup %140 }
 0x111   :  { %87 = vadd.xlane.f32.xlu0 %v141_v12 }
 0x184   :  { %v88_v13 = vpop.xlane.xlu0 %87 }
 0x185   :  { %142 = vrcp.f32 %v88_v13  ;;  %v100_v17 = vand.u32 2147483648, %v88_v13  ;;  %v98_v19 = vand.u32 2147483647, %v88_v13  ;;  %vm94_vm3 = vweird.f32 %v88_v13 }
 0x187   :  { %v101_v21 = vor.u32 1.1754944e-38, %v100_v17  ;;  %vm99_vm5 = vcmp.eq.f32.partialorder %v98_v19, 8.507059e+37 }
 0x18b   :  { %v143_v14 = vpop.eup %142 }
 0x18c   :  { %v90_v15 = vmul.f32 %v143_v14, %v88_v13  ;;  %vm95_vm2 = vweird.f32 %v143_v14 }
 0x18d   :  { %vm96_vm4 = vmor %vm94_vm3, %vm95_vm2 }
 0x18e   :  { %v91_v16 = vsub.f32 1.0, %v90_v15 }
 0x190   :  { %v92_v18 = vmul.f32 %v143_v14, %v91_v16 }
 0x192   :  { %v93_v20 = vadd.f32 %v143_v14, %v92_v18 }
 0x194   :  { %v97_v22 = vsel %vm96_vm4, %v143_v14, %v93_v20 }
 0x195   :  { %v102_v23 = vsel %vm99_vm5, %v101_v21, %v97_v22 }
 0x196   :  { %v104_v24 = vmul.f32 %v141_v12, %v102_v23 }
 0x198   :  { %105 = vst [vmem:[#allocation7] sm:$0xff] %v104_v24 }
 0x199   :  { %116 = dma.vmem_to_hbm [thread:$0]  %s112_s1, 128, %s114_s23, [#allocation4]  }
 0x19a   :  { %220 = dma.done.wait [#allocation4], 128  }
 0x19b   :  { %221 = vsyncadd [#allocation4], 4294967168 }
 0x19c   :  { %121 = vsyncpa [#allocation3], 1 }
 0x19d   :  { %122 = vsyncpa [#allocation6], 1 }
 0x19e   :  { %123 = vsyncpa [#allocation4], 1 }

</bundles_post_ra>
